<compile_context>
chip_gen: v7x
topology: tpu7x:2x2x1
jax: 0.10.0
libtpu: 0.0.40
codegen_flags: <defaults>
</compile_context>

<pallas_src>
import functools

import jax
import jax.numpy as jnp
from jax.experimental import pallas as pl
from jax.experimental.pallas import tpu as pltpu


def _round_up(x, m):
    return ((x + m - 1) // m) * m


def _choose_tile(n_pad, desired, max_tile):
    """Largest multiple of 128 <= min(desired, max_tile, n_pad) dividing n_pad."""
    t = max(128, min(desired, max_tile, n_pad))
    t = (t // 128) * 128
    while n_pad % t:
        t -= 128
    return t


def _aggregate_kernel(a_ref, xw_ref, b_ref, o_ref, acc_ref, *, apply_relu):
    """One GraphConv aggregation: acc += A_tile @ XW_tile; epilogue bias (+relu)."""
    k = pl.program_id(1)

    @pl.when(k == 0)
    def _():
        acc_ref[...] = jnp.zeros_like(acc_ref)

    acc_ref[...] += jnp.dot(
        a_ref[...], xw_ref[...], preferred_element_type=jnp.float32
    )

    @pl.when(k == pl.num_programs(1) - 1)
    def _():
        out = acc_ref[...] + b_ref[...]          # bias broadcast, epilogue only
        if apply_relu:
            out = jnp.maximum(out, 0.0)
        o_ref[...] = out.astype(o_ref.dtype)


def gcn_aggregate(a_hat_p, xw_p, b_p, *, apply_relu, out_dtype, tm=512, tk=2048):
    """out = (relu?)(A_hat_p @ xw_p + b_p), tiled over (row blocks, neighbor blocks).

    a_hat_p: (n_pad, n_pad) bf16 (pre-padded, multiple of 128)
    xw_p:    (n_pad, h)     bf16 (h multiple of 128)
    b_p:     (1, h)         f32
    Returns (n_pad, h) in out_dtype.
    """
    n_pad = a_hat_p.shape[0]
    h = xw_p.shape[1]
    assert a_hat_p.shape == (n_pad, n_pad)
    assert xw_p.shape == (n_pad, h) and b_p.shape == (1, h)
    assert n_pad % 128 == 0 and h % 128 == 0

    # Keep >= 2 row blocks whenever possible so v7x's two TensorCores both get
    # work on the "parallel" axis; v5e/v6e are unaffected.
    tm_max = n_pad if n_pad == 128 else n_pad // 2
    tm = _choose_tile(n_pad, tm, tm_max)
    tk = _choose_tile(n_pad, tk, n_pad)
    grid = (n_pad // tm, n_pad // tk)

    out_isz = jnp.dtype(out_dtype).itemsize
    # Working set: double-buffered A / XW / out tiles + f32 accumulator + bias.
    work = (2 * tm * tk * 2 + 2 * tk * h * 2 + 2 * tm * h * out_isz
            + tm * h * 4 + 2 * h * 4)
    vmem_limit = min(64 * 1024 * 1024, int(work) + (8 << 20))

    flops = 2 * n_pad * n_pad * h
    bytes_accessed = int(
        n_pad * n_pad * 2                     # A_hat stream (bf16)
        + (n_pad // tm) * n_pad * h * 2       # XW (re-read per row block at most)
        + n_pad * h * out_isz                 # output
        + h * 4                               # bias
    )

    return pl.pallas_call(
        functools.partial(_aggregate_kernel, apply_relu=apply_relu),
        out_shape=jax.ShapeDtypeStruct((n_pad, h), out_dtype),
        grid_spec=pltpu.PrefetchScalarGridSpec(
            num_scalar_prefetch=0,
            grid=grid,
            in_specs=[
                pl.BlockSpec((tm, tk), lambda i, k: (i, k)),  # A_hat tile
                pl.BlockSpec((tk, h), lambda i, k: (k, 0)),   # XW rows for block k
                pl.BlockSpec((1, h), lambda i, k: (0, 0)),    # bias (resident)
            ],
            out_specs=pl.BlockSpec((tm, h), lambda i, k: (i, 0)),
            scratch_shapes=[pltpu.VMEM((tm, h), jnp.float32)],
        ),
        compiler_params=pltpu.CompilerParams(
            dimension_semantics=("parallel", "arbitrary"),
            vmem_limit_bytes=vmem_limit,
        ),
        cost_estimate=pl.CostEstimate(
            flops=int(flops), transcendentals=0, bytes_accessed=bytes_accessed
        ),
    )(a_hat_p, xw_p, b_p)


def net_attack_forward(a_hat, x, w0, b0, w1, b1, *, tm=512, tk=2048):
    """Full Net_attack forward. Returns (N, label_number) float32 logits."""
    n = a_hat.shape[0]
    feat = x.shape[1]
    hid, lab = w0.shape[1], w1.shape[1]
    hid_p, lab_p = _round_up(hid, 128), _round_up(lab, 128)
    n_pad = _round_up(n, 128)

    # Pad + bf16-cast the dense normalized adjacency ONCE; shared by both layers.
    a_p = jnp.zeros((n_pad, n_pad), jnp.bfloat16).at[:n, :n].set(
        a_hat.astype(jnp.bfloat16))

    # ---------- layer 0: XW0 precomputed outside the kernel (feat-first) ----------
    x_p = jnp.zeros((n_pad, feat), jnp.float32).at[:n].set(x.astype(jnp.float32))
    w0_p = jnp.zeros((feat, hid_p), jnp.float32).at[:, :hid].set(
        w0.astype(jnp.float32))
    xw0 = (x_p.astype(jnp.bfloat16).astype(jnp.float32)
           @ w0_p.astype(jnp.bfloat16).astype(jnp.float32)).astype(jnp.bfloat16)
    b0_p = jnp.zeros((1, hid_p), jnp.float32).at[0, :hid].set(b0.astype(jnp.float32))
    h1 = gcn_aggregate(a_p, xw0, b0_p, apply_relu=True,
                       out_dtype=jnp.bfloat16, tm=tm, tk=tk)

    # ---------- layer 1 ----------
    # Padded rows of h1 may be relu(b0) != 0, but the corresponding (zero) padded
    # columns of a_p annihilate them in the aggregation, so no slicing is needed.
    w1_p = jnp.zeros((hid_p, lab_p), jnp.float32).at[:hid, :lab].set(
        w1.astype(jnp.float32))
    xw1 = (h1.astype(jnp.float32)
           @ w1_p.astype(jnp.bfloat16).astype(jnp.float32)).astype(jnp.bfloat16)
    b1_p = jnp.zeros((1, lab_p), jnp.float32).at[0, :lab].set(b1.astype(jnp.float32))
    out = gcn_aggregate(a_p, xw1, b1_p, apply_relu=False,
                        out_dtype=jnp.float32, tm=tm, tk=tk)
    return out[:n, :lab]


def reference_forward(a_hat, x, w0, b0, w1, b1):
    """Pure-JAX reference mirroring the kernel's bf16-MXU / f32-accumulate numerics."""
    af = a_hat.astype(jnp.bfloat16).astype(jnp.float32)
    xf = x.astype(jnp.bfloat16).astype(jnp.float32)
    w0f = w0.astype(jnp.bfloat16).astype(jnp.float32)
    w1f = w1.astype(jnp.bfloat16).astype(jnp.float32)
    xw0 = (xf @ w0f).astype(jnp.bfloat16).astype(jnp.float32)
    h1 = jnp.maximum(af @ xw0 + b0, 0.0).astype(jnp.bfloat16).astype(jnp.float32)
    hw1 = (h1 @ w1f).astype(jnp.bfloat16).astype(jnp.float32)
    return af @ hw1 + b1


if __name__ == "__main__":
    N = 256           # number of graph nodes (pads to 256 -> 2 row blocks x 1 k block)
    FEAT = 32         # feature_number
    HID = 16          # GraphConv hidden size (fixed at 16 in the module)
    LABELS = 8        # label_number

    key = jax.random.PRNGKey(0)
    k_adj, k_x, k_w0, k_w1 = jax.random.split(key, 4)

    # Deterministic synthetic graph: random symmetric adjacency + self loops.
    a = (jax.random.uniform(k_adj, (N, N)) < 0.25).astype(jnp.float32)
    a = jnp.maximum(a, a.T)
    a = jnp.maximum(a, jnp.eye(N, dtype=jnp.float32))

    # Symmetric 'both' normalization, degrees clamped to >= 1 (DGL behavior).
    deg = jnp.clip(a.sum(axis=1), 1.0, None)
    d_inv_sqrt = 1.0 / jnp.sqrt(deg)
    a_hat = d_inv_sqrt[:, None] * a * d_inv_sqrt[None, :]

    # Node features.
    x = jax.random.normal(k_x, (N, FEAT), dtype=jnp.float32)

    # Deterministic parameter init (Glorot-style scaling), biases zero.
    w0 = jax.random.normal(k_w0, (FEAT, HID), dtype=jnp.float32) * jnp.sqrt(
        2.0 / (FEAT + HID))
    b0 = jnp.zeros((HID,), dtype=jnp.float32)
    w1 = jax.random.normal(k_w1, (HID, LABELS), dtype=jnp.float32) * jnp.sqrt(
        2.0 / (HID + LABELS))
    b1 = jnp.zeros((LABELS,), dtype=jnp.float32)

    fwd = jax.jit(net_attack_forward)
    out = jax.block_until_ready(fwd(a_hat, x, w0, b0, w1, b1))

    ref = reference_forward(a_hat, x, w0, b0, w1, b1)
    assert out.shape == (N, LABELS)
    assert jnp.allclose(out, ref, atol=2e-2, rtol=2e-2), "mismatch vs reference"

    print("KERNEL_OK")
</pallas_src>

<mosaic_0001>
module attributes {stable_mosaic.version = 11 : i64} {
  func.func @_aggregate_kernel(%arg0: i32, %arg1: i32, %arg2: memref<128x256xbf16, #tpu.memory_space<vmem>>, %arg3: memref<256x128xbf16, #tpu.memory_space<vmem>>, %arg4: memref<1x128xf32, #tpu.memory_space<vmem>>, %arg5: memref<128x128xbf16, #tpu.memory_space<vmem>>, %arg6: memref<128x128xf32, #tpu.memory_space<vmem>>) attributes {dimension_semantics = [#tpu.dimension_semantics<parallel>, #tpu.dimension_semantics<arbitrary>], iteration_bounds = array<i64: 2, 1>, scalar_prefetch = 0 : i64, scratch_operands = 1 : i64, tpu.core_type = #tpu.core_type<tc>, window_params = [{transform_indices = @transform_0, window_bounds = array<i64: 128, 256>}, {transform_indices = @transform_1, window_bounds = array<i64: 256, 128>}, {pipeline_mode = #tpu.pipeline_mode<synchronous>, transform_indices = @transform_2, window_bounds = array<i64: 1, 128>}, {transform_indices = @transform_3, window_bounds = array<i64: 128, 128>}]} {
    %c0_i32 = arith.constant 0 : i32
    %0 = arith.cmpi eq, %arg1, %c0_i32 : i32
    %1 = arith.extui %0 : i1 to i32
    %c0_i32_0 = arith.constant 0 : i32
    %2 = arith.cmpi ne, %1, %c0_i32_0 : i32
    scf.if %2 {
      %cst_10 = arith.constant 0.000000e+00 : f32
      %12 = vector.broadcast %cst_10 : f32 to vector<128x128xf32>
      %c0_11 = arith.constant 0 : index
      %c0_12 = arith.constant 0 : index
      %13 = vector.load %arg6[%c0_11, %c0_12] : memref<128x128xf32, #tpu.memory_space<vmem>>, vector<128x128xf32>
      tpu.vector_store %arg6[%c0_11, %c0_12], %12 {strides = array<i32>} : memref<128x128xf32, #tpu.memory_space<vmem>>, vector<128x128xf32>,
    } else {
    }
    %c0 = arith.constant 0 : index
    %c0_1 = arith.constant 0 : index
    %3 = vector.load %arg6[%c0, %c0_1] : memref<128x128xf32, #tpu.memory_space<vmem>>, vector<128x128xf32>
    %c0_2 = arith.constant 0 : index
    %c0_3 = arith.constant 0 : index
    %4 = vector.load %arg2[%c0_2, %c0_3] : memref<128x256xbf16, #tpu.memory_space<vmem>>, vector<128x256xbf16>
    %c0_4 = arith.constant 0 : index
    %c0_5 = arith.constant 0 : index
    %5 = vector.load %arg3[%c0_4, %c0_5] : memref<256x128xbf16, #tpu.memory_space<vmem>>, vector<256x128xbf16>
    %cst = arith.constant dense<0.000000e+00> : vector<128x128xf32>
    %6 = tpu.matmul %4, %5, %cst {dimension_numbers = #tpu.dot_dimension_numbers<[1], [0], [0], [1], [0, 0, 1, 1], [], []>} : vector<128x256xbf16>, vector<256x128xbf16>, vector<128x128xf32> -> vector<128x128xf32>
    %7 = arith.addf %3, %6 : vector<128x128xf32>
    %c0_6 = arith.constant 0 : index
    %c0_7 = arith.constant 0 : index
    %8 = vector.load %arg6[%c0_6, %c0_7] : memref<128x128xf32, #tpu.memory_space<vmem>>, vector<128x128xf32>
    tpu.vector_store %arg6[%c0_6, %c0_7], %7 {strides = array<i32>} : memref<128x128xf32, #tpu.memory_space<vmem>>, vector<128x128xf32>,
    %c0_i32_8 = arith.constant 0 : i32
    %9 = arith.cmpi eq, %arg1, %c0_i32_8 : i32
    %10 = arith.extui %9 : i1 to i32
    %c0_i32_9 = arith.constant 0 : i32
    %11 = arith.cmpi ne, %10, %c0_i32_9 : i32
    scf.if %11 {
      %c0_10 = arith.constant 0 : index
      %c0_11 = arith.constant 0 : index
      %12 = vector.load %arg6[%c0_10, %c0_11] : memref<128x128xf32, #tpu.memory_space<vmem>>, vector<128x128xf32>
      %c0_12 = arith.constant 0 : index
      %c0_13 = arith.constant 0 : index
      %13 = vector.load %arg4[%c0_12, %c0_13] : memref<1x128xf32, #tpu.memory_space<vmem>>, vector<1x128xf32>
      %14 = vector.broadcast %13 : vector<1x128xf32> to vector<128x128xf32>
      %15 = arith.addf %12, %14 : vector<128x128xf32>
      %cst_14 = arith.constant 0.000000e+00 : f32
      %16 = vector.broadcast %cst_14 : f32 to vector<128x128xf32>
      %17 = arith.maximumf %15, %16 : vector<128x128xf32>
      %18 = arith.truncf %17 : vector<128x128xf32> to vector<128x128xbf16>
      %c0_15 = arith.constant 0 : index
      %c0_16 = arith.constant 0 : index
      %19 = vector.load %arg5[%c0_15, %c0_16] : memref<128x128xbf16, #tpu.memory_space<vmem>>, vector<128x128xbf16>
      tpu.vector_store %arg5[%c0_15, %c0_16], %18 {strides = array<i32>} : memref<128x128xbf16, #tpu.memory_space<vmem>>, vector<128x128xbf16>,
    } else {
    }
    return
  }
  func.func @transform_0(%arg0: i32, %arg1: i32) -> (i32, i32) {
    %c0_i32 = arith.constant 0 : i32
    return %arg0, %arg1 : i32, i32
  }
  func.func @transform_1(%arg0: i32, %arg1: i32) -> (i32, i32) {
    %c0_i32 = arith.constant 0 : i32
    %c0_i32_0 = arith.constant 0 : i32
    return %arg1, %c0_i32 : i32, i32
  }
  func.func @transform_2(%arg0: i32, %arg1: i32) -> (i32, i32) {
    %c0_i32 = arith.constant 0 : i32
    %c0_i32_0 = arith.constant 0 : i32
    %c0_i32_1 = arith.constant 0 : i32
    return %c0_i32, %c0_i32_0 : i32, i32
  }
  func.func @transform_3(%arg0: i32, %arg1: i32) -> (i32, i32) {
    %c0_i32 = arith.constant 0 : i32
    %c0_i32_0 = arith.constant 0 : i32
    return %arg0, %c0_i32 : i32, i32
  }
}

module attributes {stable_mosaic.version = 11 : i64} {
  func.func @_aggregate_kernel(%arg0: i32, %arg1: i32, %arg2: memref<128x256xbf16, #tpu.memory_space<vmem>>, %arg3: memref<256x128xbf16, #tpu.memory_space<vmem>>, %arg4: memref<1x128xf32, #tpu.memory_space<vmem>>, %arg5: memref<128x128xf32, #tpu.memory_space<vmem>>, %arg6: memref<128x128xf32, #tpu.memory_space<vmem>>) attributes {dimension_semantics = [#tpu.dimension_semantics<parallel>, #tpu.dimension_semantics<arbitrary>], iteration_bounds = array<i64: 2, 1>, scalar_prefetch = 0 : i64, scratch_operands = 1 : i64, tpu.core_type = #tpu.core_type<tc>, window_params = [{transform_indices = @transform_0, window_bounds = array<i64: 128, 256>}, {transform_indices = @transform_1, window_bounds = array<i64: 256, 128>}, {pipeline_mode = #tpu.pipeline_mode<synchronous>, transform_indices = @transform_2, window_bounds = array<i64: 1, 128>}, {transform_indices = @transform_3, window_bounds = array<i64: 128, 128>}]} {
    %c0_i32 = arith.constant 0 : i32
    %0 = arith.cmpi eq, %arg1, %c0_i32 : i32
    %1 = arith.extui %0 : i1 to i32
    %c0_i32_0 = arith.constant 0 : i32
    %2 = arith.cmpi ne, %1, %c0_i32_0 : i32
    scf.if %2 {
      %cst_10 = arith.constant 0.000000e+00 : f32
      %12 = vector.broadcast %cst_10 : f32 to vector<128x128xf32>
      %c0_11 = arith.constant 0 : index
      %c0_12 = arith.constant 0 : index
      %13 = vector.load %arg6[%c0_11, %c0_12] : memref<128x128xf32, #tpu.memory_space<vmem>>, vector<128x128xf32>
      tpu.vector_store %arg6[%c0_11, %c0_12], %12 {strides = array<i32>} : memref<128x128xf32, #tpu.memory_space<vmem>>, vector<128x128xf32>,
    } else {
    }
    %c0 = arith.constant 0 : index
    %c0_1 = arith.constant 0 : index
    %3 = vector.load %arg6[%c0, %c0_1] : memref<128x128xf32, #tpu.memory_space<vmem>>, vector<128x128xf32>
    %c0_2 = arith.constant 0 : index
    %c0_3 = arith.constant 0 : index
    %4 = vector.load %arg2[%c0_2, %c0_3] : memref<128x256xbf16, #tpu.memory_space<vmem>>, vector<128x256xbf16>
    %c0_4 = arith.constant 0 : index
    %c0_5 = arith.constant 0 : index
    %5 = vector.load %arg3[%c0_4, %c0_5] : memref<256x128xbf16, #tpu.memory_space<vmem>>, vector<256x128xbf16>
    %cst = arith.constant dense<0.000000e+00> : vector<128x128xf32>
    %6 = tpu.matmul %4, %5, %cst {dimension_numbers = #tpu.dot_dimension_numbers<[1], [0], [0], [1], [0, 0, 1, 1], [], []>} : vector<128x256xbf16>, vector<256x128xbf16>, vector<128x128xf32> -> vector<128x128xf32>
    %7 = arith.addf %3, %6 : vector<128x128xf32>
    %c0_6 = arith.constant 0 : index
    %c0_7 = arith.constant 0 : index
    %8 = vector.load %arg6[%c0_6, %c0_7] : memref<128x128xf32, #tpu.memory_space<vmem>>, vector<128x128xf32>
    tpu.vector_store %arg6[%c0_6, %c0_7], %7 {strides = array<i32>} : memref<128x128xf32, #tpu.memory_space<vmem>>, vector<128x128xf32>,
    %c0_i32_8 = arith.constant 0 : i32
    %9 = arith.cmpi eq, %arg1, %c0_i32_8 : i32
    %10 = arith.extui %9 : i1 to i32
    %c0_i32_9 = arith.constant 0 : i32
    %11 = arith.cmpi ne, %10, %c0_i32_9 : i32
    scf.if %11 {
      %c0_10 = arith.constant 0 : index
      %c0_11 = arith.constant 0 : index
      %12 = vector.load %arg6[%c0_10, %c0_11] : memref<128x128xf32, #tpu.memory_space<vmem>>, vector<128x128xf32>
      %c0_12 = arith.constant 0 : index
      %c0_13 = arith.constant 0 : index
      %13 = vector.load %arg4[%c0_12, %c0_13] : memref<1x128xf32, #tpu.memory_space<vmem>>, vector<1x128xf32>
      %14 = vector.broadcast %13 : vector<1x128xf32> to vector<128x128xf32>
      %15 = arith.addf %12, %14 : vector<128x128xf32>
      %c0_14 = arith.constant 0 : index
      %c0_15 = arith.constant 0 : index
      %16 = vector.load %arg5[%c0_14, %c0_15] : memref<128x128xf32, #tpu.memory_space<vmem>>, vector<128x128xf32>
      tpu.vector_store %arg5[%c0_14, %c0_15], %15 {strides = array<i32>} : memref<128x128xf32, #tpu.memory_space<vmem>>, vector<128x128xf32>,
    } else {
    }
    return
  }
  func.func @transform_0(%arg0: i32, %arg1: i32) -> (i32, i32) {
    %c0_i32 = arith.constant 0 : i32
    return %arg0, %arg1 : i32, i32
  }
  func.func @transform_1(%arg0: i32, %arg1: i32) -> (i32, i32) {
    %c0_i32 = arith.constant 0 : i32
    %c0_i32_0 = arith.constant 0 : i32
    return %arg1, %c0_i32 : i32, i32
  }
  func.func @transform_2(%arg0: i32, %arg1: i32) -> (i32, i32) {
    %c0_i32 = arith.constant 0 : i32
    %c0_i32_0 = arith.constant 0 : i32
    %c0_i32_1 = arith.constant 0 : i32
    return %c0_i32, %c0_i32_0 : i32, i32
  }
  func.func @transform_3(%arg0: i32, %arg1: i32) -> (i32, i32) {
    %c0_i32 = arith.constant 0 : i32
    %c0_i32_0 = arith.constant 0 : i32
    return %arg0, %c0_i32 : i32, i32
  }
}

</mosaic_0001>

<bundles_post_ra>
// kernel: net_attack_forward.2
= control target key start
LH: loop header
LB: loop body
LE: loop exit
PB: predicated region body
PF: predicated region fallthrough
CT: control target
= control target key end

     0   :  { %s1012_s12 = smov 0   ;;  %s1014_s13 = smov 0   ;;  %s1146_s0 = inlined_call_operand.vmem [shape: bf16[256,256], index: 0, kind: input, shape index: {}]   ;;  %s1147_s1 = inlined_call_operand.vmem [shape: bf16[256,128], index: 1, kind: input, shape index: {}]   ;;  %s1148_s2 = inlined_call_operand.vmem [shape: f32[1,128], index: 2, kind: input, shape index: {}]   ;;  %s1149_s3 = inlined_call_operand.vmem [shape: bf16[256,128], index: 3, kind: output, shape index: {}]  }
   0x1   :  { %s1016_s14 = smov 0  }
   0x2 LB: > { %s25_s15 = sadd.s32 1, %s986_s13  ;;  %p782_p0 = scmp.ge.s32.totalorder %s990_s14, 1  ;;  %s990_s14 = sphi %s1016_s14, %s13_s14   ;;  %s986_s13 = sphi %s1014_s13, %s1151_s13   ;;  %s982_s12 = sphi %s1012_s12, %s1150_s12  }
   0x3   : > { %p27_p1 = scmp.ge.s32.totalorder %s25_s15, 2  ;;  %p169_p2 = scmp.lt.s32.totalorder %s990_s14, 3 }
   0x5   : > { %s1153_s15 = smov (%p27_p1, %s25_s15), 0  ;;  %p170_p3 = pnand %p782_p0, %p169_p2 }
   0x6   : > { %v928_v0 = vld [vmem:[%s1147_s1 + $0x40] sm:$0xff] (!%p170_p3)   ;;  %s783_s18 = sshll.u32 (!%p170_p3), %s982_s12, 4  ;;  %v930_v2 = vld [vmem:[%s1147_s1 + $0x48] sm:$0xff] (!%p170_p3)   ;;  %v932_v4 = vld [vmem:[%s1147_s1 + $0x50] sm:$0xff] (!%p170_p3)   ;;  %s786_s30 = sshll.u32 (!%p170_p3), %s982_s12, 3 }
   0x7   : > { %173 = sbr.rel (%p170_p3) target bundleno = 288 (0x120), region = 32  ;;  %v929_v1 = vld [vmem:[%s1147_s1] sm:$0xff] (!%p170_p3)   ;;  %824 = vmatprep.subr.bf16.mxu0 (!%p170_p3), %v928_v0  ;;  %888 = vmatprep.subr.bf16.mxu1 (!%p170_p3), %v928_v0  ;;  %v931_v3 = vld [vmem:[%s1147_s1 + $0x8] sm:$0xff] (!%p170_p3)   ;;  %p205_p4 = scmp.lt.s32.totalorder (!%p170_p3), %s783_s18, 31  ;;  %v933_v5 = vld [vmem:[%s1147_s1 + $0x10] sm:$0xff] (!%p170_p3)  }
   0x8   : > { %825 = vmatpush3.bf16.msra.mxu0 (!%p170_p3), %v929_v1  ;;  %896 = vmatpush3.bf16.msra.mxu1 (!%p170_p3), %v929_v1  ;;  %v934_v6 = vld [vmem:[%s1147_s1 + $0x58] sm:$0xff] (!%p170_p3)   ;;  %v936_v8 = vld [vmem:[%s1147_s1 + $0x60] sm:$0xff] (!%p170_p3)   ;;  %v938_v10 = vld [vmem:[%s1147_s1 + $0x68] sm:$0xff] (!%p170_p3)   ;;  %p222_p5 = scmp.lt.s32.totalorder (!%p170_p3), %s786_s30, 15 }
   0x9   : > { %826 = vmatprep.subr.bf16.mxu0 (!%p170_p3), %v930_v2  ;;  %889 = vmatprep.subr.bf16.mxu1 (!%p170_p3), %v930_v2  ;;  %v935_v7 = vld [vmem:[%s1147_s1 + $0x18] sm:$0xff] (!%p170_p3)   ;;  %v937_v9 = vld [vmem:[%s1147_s1 + $0x20] sm:$0xff] (!%p170_p3)   ;;  %v939_v13 = vld [vmem:[%s1147_s1 + $0x28] sm:$0xff] (!%p170_p3)  }
   0xa   : > { %v940_v14 = vld [vmem:[%s1147_s1 + $0x70] sm:$0xff] (!%p170_p3)   ;;  %v942_v16 = vld [vmem:[%s1147_s1 + $0x78] sm:$0xff] (!%p170_p3)   ;;  %v1106_v35 = vld [vmem:[%s1148_s2] ss:$0 sm:$0xff] (!%p170_p3) }
   0xb   : > { %v941_v15 = vld [vmem:[%s1147_s1 + $0x30] sm:$0xff] (!%p170_p3)   ;;  %v943_v17 = vld [vmem:[%s1147_s1 + $0x38] sm:$0xff] (!%p170_p3)  }
   0xc   : > { %827 = vmatpush3.bf16.msra.mxu0 (!%p170_p3), %v931_v3  ;;  %897 = vmatpush3.bf16.msra.mxu1 (!%p170_p3), %v931_v3 }
   0xd   : > { %828 = vmatprep.subr.bf16.mxu0 (!%p170_p3), %v932_v4  ;;  %890 = vmatprep.subr.bf16.mxu1 (!%p170_p3), %v932_v4 }
   0xe   : > { %s1155_s18 = smov (!%p205_p4, %s783_s18), 31  ;;  %s1157_s30 = smov (!%p222_p5, %s786_s30), 15 }
   0xf   : > { %s823_s6 = sshll.u32 %s1155_s18, 3  ;;  %s787_s12 = sshll.u32 %s1157_s30, 3 }
  0x10   : > { %829 = vmatpush3.bf16.msra.mxu0 %v933_v5  ;;  %898 = vmatpush3.bf16.msra.mxu1 %v933_v5  ;;  %s1063_s11 = scalar_lea.vmem %s1146_s0, %s823_s6  ;;  %s1115_s8 = scalar_lea.vmem %s1149_s3, %s787_s12 }
  0x11   : > { %830 = vmatprep.subr.bf16.mxu0 %v934_v6  ;;  %891 = vmatprep.subr.bf16.mxu1 %v934_v6  ;;  %v946_v11 = vld [vmem:[%s1063_s11 + $0x4] ss:$8 sps:$4 sm:$0xff]   ;;  %v944_v18 = vld [vmem:[%s1063_s11] ss:$8 sps:$4 sm:$0xff]   ;;  %v950_v20 = vld [vmem:[%s1063_s11 + $0x14] ss:$8 sps:$4 sm:$0xff]  }
  0x12   : > { %v949_v12 = vld [vmem:[%s1063_s11 + $0x44] ss:$8 sps:$4 sm:$0xff]   ;;  %520 = vmatprep.mubr.bf16.mxu0 %v946_v11  ;;  %v947_v19 = vld [vmem:[%s1063_s11 + $0x40] ss:$8 sps:$4 sm:$0xff]   ;;  %v952_v21 = vld [vmem:[%s1063_s11 + $0x54] ss:$8 sps:$4 sm:$0xff]  }
  0x13   : > { %552 = vmatprep.mubr.bf16.mxu1 %v949_v12  ;;  %v954_v22 = vld [vmem:[%s1063_s11 + $0x10] ss:$8 sps:$4 sm:$0xff]   ;;  %v956_v24 = vld [vmem:[%s1063_s11 + $0x24] ss:$8 sps:$4 sm:$0xff]   ;;  %v960_v26 = vld [vmem:[%s1063_s11 + $0x20] ss:$8 sps:$4 sm:$0xff]  }
  0x14   : > { %831 = vmatpush3.bf16.msra.mxu0 %v935_v7  ;;  %899 = vmatpush3.bf16.msra.mxu1 %v935_v7  ;;  %v955_v23 = vld [vmem:[%s1063_s11 + $0x50] ss:$8 sps:$4 sm:$0xff]   ;;  %v958_v25 = vld [vmem:[%s1063_s11 + $0x64] ss:$8 sps:$4 sm:$0xff]   ;;  %v961_v27 = vld [vmem:[%s1063_s11 + $0x60] ss:$8 sps:$4 sm:$0xff]  }
  0x15   : > { %832 = vmatprep.subr.bf16.mxu0 %v936_v8  ;;  %892 = vmatprep.subr.bf16.mxu1 %v936_v8  ;;  %v962_v28 = vld [vmem:[%s1063_s11 + $0x34] ss:$8 sps:$4 sm:$0xff]   ;;  %v966_v30 = vld [vmem:[%s1063_s11 + $0x30] ss:$8 sps:$4 sm:$0xff]  }
  0x16   : > { %v964_v29 = vld [vmem:[%s1063_s11 + $0x74] ss:$8 sps:$4 sm:$0xff]   ;;  %v967_v31 = vld [vmem:[%s1063_s11 + $0x70] ss:$8 sps:$4 sm:$0xff]  }
  0x18   : > { %833 = vmatpush3.bf16.msra.mxu0 %v937_v9  ;;  %900 = vmatpush3.bf16.msra.mxu1 %v937_v9 }
  0x19   : > { %834 = vmatprep.subr.bf16.mxu0 %v938_v10  ;;  %893 = vmatprep.subr.bf16.mxu1 %v938_v10 }
  0x1c   : > { %835 = vmatpush3.bf16.msra.mxu0 %v939_v13  ;;  %901 = vmatpush3.bf16.msra.mxu1 %v939_v13 }
  0x1d   : > { %836 = vmatprep.subr.bf16.mxu0 %v940_v14  ;;  %894 = vmatprep.subr.bf16.mxu1 %v940_v14 }
  0x20   : > { %837 = vmatpush3.bf16.msra.mxu0 %v941_v15  ;;  %902 = vmatpush3.bf16.msra.mxu1 %v941_v15 }
  0x21   : > { %838 = vmatprep.subr.bf16.mxu0 %v942_v16  ;;  %895 = vmatprep.subr.bf16.mxu1 %v942_v16 }
  0x24   : > { %839 = vmatpush3.bf16.msra.mxu0 %v943_v17  ;;  %903 = vmatpush3.bf16.msra.mxu1 %v943_v17 }
  0x27   : > { %521 = vmatmul.mubr.bf16.vlgmr.msra.gmra.mrb[0].mxu0 %v944_v18  ;;  %553 = vmatmul.mubr.bf16.vlgmr.msra.gmra.mrb[0].mxu1 %v947_v19 }
  0x28   : > { %528 = vmatprep.mubr.bf16.mxu0 %v950_v20  ;;  %560 = vmatprep.mubr.bf16.mxu1 %v952_v21 }
  0x2f   : > { %529 = vmatmul.mubr.bf16.gmra.mrb[4].mxu0 %v954_v22  ;;  %561 = vmatmul.mubr.bf16.gmra.mrb[4].mxu1 %v955_v23 }
  0x30   : > { %536 = vmatprep.mubr.bf16.mxu0 %v956_v24  ;;  %568 = vmatprep.mubr.bf16.mxu1 %v958_v25 }
  0x37   : > { %537 = vmatmul.mubr.bf16.gmra.mrb[8].mxu0 %v960_v26  ;;  %569 = vmatmul.mubr.bf16.gmra.mrb[8].mxu1 %v961_v27 }
  0x38   : > { %544 = vmatprep.mubr.bf16.mxu0 %v962_v28  ;;  %576 = vmatprep.mubr.bf16.mxu1 %v964_v29 }
  0x3f   : > { %545 = vmatmul.mubr.bf16.gmra.mrb[12].mxu0 %v966_v30  ;;  %577 = vmatmul.mubr.bf16.gmra.mrb[12].mxu1 %v967_v31 }
  0xfa   : > { %v840_v32 = vpop.f32.mrb[0].mxu0  ;;  %v864_v33 = vpop.f32.mrb[0].mxu1 }
  0xfb   : > { %v841_v34 = vpop.f32.mrb[1].mxu0  ;;  %v865_v36 = vpop.f32.mrb[1].mxu1 }
  0xfc   : > { %v842_v37 = vadd.f32 %v841_v34, %v840_v32  ;;  %v866_v38 = vadd.f32 %v865_v36, %v864_v33  ;;  %v843_v39 = vpop.f32.mrb[2].mxu0  ;;  %v867_v40 = vpop.f32.mrb[2].mxu1 }
  0xfd   : > { %v844_v41 = vpop.f32.mrb[3].mxu0  ;;  %v868_v42 = vpop.f32.mrb[3].mxu1 }
  0xfe   : > { %v643_v43 = vadd.f32 %v842_v37, %v1106_v35  ;;  %v651_v44 = vadd.f32 %v866_v38, %v1106_v35  ;;  %v845_v45 = vadd.f32 %v844_v41, %v843_v39  ;;  %v869_v46 = vadd.f32 %v868_v42, %v867_v40 }
 0x100   : > { %v644_v47 = vadd.f32 %v845_v45, %v1106_v35  ;;  %v652_v48 = vadd.f32 %v869_v46, %v1106_v35  ;;  %v659_v49 = vmax.f32 %v643_v43, 0.0  ;;  %v667_v50 = vmax.f32 %v651_v44, 0.0 }
 0x102   : > { %v660_v51 = vmax.f32 %v644_v47, 0.0  ;;  %v668_v52 = vmax.f32 %v652_v48, 0.0  ;;  %v846_v53 = vpop.f32.mrb[4].mxu0  ;;  %v870_v54 = vpop.f32.mrb[4].mxu1 }
 0x103   : > { %v847_v55 = vpop.f32.mrb[5].mxu0  ;;  %v871_v56 = vpop.f32.mrb[5].mxu1 }
 0x104   : > { %v675_v57 = vpack.c.bf16 %v660_v51, %v659_v49  ;;  %v679_v58 = vpack.c.bf16 %v668_v52, %v667_v50  ;;  %v848_v59 = vadd.f32 %v847_v55, %v846_v53  ;;  %v872_v60 = vadd.f32 %v871_v56, %v870_v54  ;;  %v849_v61 = vpop.f32.mrb[6].mxu0  ;;  %v873_v62 = vpop.f32.mrb[6].mxu1 }
 0x105   : > { %v850_v63 = vpop.f32.mrb[7].mxu0  ;;  %v874_v0 = vpop.f32.mrb[7].mxu1 }
 0x106   : > { %683 = vst [vmem:[%s1115_s8] sm:$0xff] %v675_v57  ;;  %687 = vst [vmem:[%s1115_s8 + $0x20] sm:$0xff] %v679_v58  ;;  %v645_v1 = vadd.f32 %v848_v59, %v1106_v35  ;;  %v653_v2 = vadd.f32 %v872_v60, %v1106_v35  ;;  %v851_v3 = vadd.f32 %v850_v63, %v849_v61 }
 0x107   : > { %v875_v4 = vadd.f32 %v874_v0, %v873_v62 }
 0x108   : > { %v646_v5 = vadd.f32 %v851_v3, %v1106_v35  ;;  %v661_v7 = vmax.f32 %v645_v1, 0.0  ;;  %v669_v8 = vmax.f32 %v653_v2, 0.0 }
 0x109   : > { %v654_v6 = vadd.f32 %v875_v4, %v1106_v35 }
 0x10a   : > { %v662_v9 = vmax.f32 %v646_v5, 0.0  ;;  %v852_v11 = vpop.f32.mrb[8].mxu0  ;;  %v876_v12 = vpop.f32.mrb[8].mxu1 }
 0x10b   : > { %v670_v10 = vmax.f32 %v654_v6, 0.0  ;;  %v853_v13 = vpop.f32.mrb[9].mxu0  ;;  %v877_v14 = vpop.f32.mrb[9].mxu1 }
 0x10c   : > { %v676_v15 = vpack.c.bf16 %v662_v9, %v661_v7  ;;  %v854_v17 = vadd.f32 %v853_v13, %v852_v11  ;;  %v878_v18 = vadd.f32 %v877_v14, %v876_v12  ;;  %v855_v19 = vpop.f32.mrb[10].mxu0  ;;  %v879_v20 = vpop.f32.mrb[10].mxu1 }
 0x10d   : > { %v680_v16 = vpack.c.bf16 %v670_v10, %v669_v8  ;;  %v856_v21 = vpop.f32.mrb[11].mxu0  ;;  %v880_v22 = vpop.f32.mrb[11].mxu1 }
 0x10e   : > { %684 = vst [vmem:[%s1115_s8 + $0x8] sm:$0xff] %v676_v15  ;;  %v647_v23 = vadd.f32 %v854_v17, %v1106_v35  ;;  %v655_v24 = vadd.f32 %v878_v18, %v1106_v35  ;;  %v857_v25 = vadd.f32 %v856_v21, %v855_v19  ;;  %v881_v26 = vadd.f32 %v880_v22, %v879_v20 }
 0x10f   : > { %688 = vst [vmem:[%s1115_s8 + $0x28] sm:$0xff] %v680_v16 }
 0x110   : > { %v648_v27 = vadd.f32 %v857_v25, %v1106_v35  ;;  %v656_v28 = vadd.f32 %v881_v26, %v1106_v35  ;;  %v663_v29 = vmax.f32 %v647_v23, 0.0  ;;  %v671_v30 = vmax.f32 %v655_v24, 0.0 }
 0x112   : > { %v664_v31 = vmax.f32 %v648_v27, 0.0  ;;  %v672_v32 = vmax.f32 %v656_v28, 0.0  ;;  %v858_v33 = vpop.f32.mrb[12].mxu0  ;;  %v882_v34 = vpop.f32.mrb[12].mxu1 }
 0x113   : > { %v859_v36 = vpop.f32.mrb[13].mxu0  ;;  %v883_v37 = vpop.f32.mrb[13].mxu1 }
 0x114   : > { %v677_v38 = vpack.c.bf16 %v664_v31, %v663_v29  ;;  %v681_v39 = vpack.c.bf16 %v672_v32, %v671_v30  ;;  %v860_v40 = vadd.f32 %v859_v36, %v858_v33  ;;  %v884_v41 = vadd.f32 %v883_v37, %v882_v34  ;;  %v861_v42 = vpop.f32.mrb[14].mxu0  ;;  %v885_v43 = vpop.f32.mrb[14].mxu1 }
 0x115   : > { %v862_v44 = vpop.f32.mrb[15].mxu0  ;;  %v886_v45 = vpop.f32.mrb[15].mxu1 }
 0x116   : > { %685 = vst [vmem:[%s1115_s8 + $0x10] sm:$0xff] %v677_v38  ;;  %689 = vst [vmem:[%s1115_s8 + $0x30] sm:$0xff] %v681_v39  ;;  %v649_v46 = vadd.f32 %v860_v40, %v1106_v35  ;;  %v657_v47 = vadd.f32 %v884_v41, %v1106_v35  ;;  %v863_v48 = vadd.f32 %v862_v44, %v861_v42 }
 0x117   : > { %v887_v49 = vadd.f32 %v886_v45, %v885_v43 }
 0x118   : > { %v650_v50 = vadd.f32 %v863_v48, %v1106_v35  ;;  %v665_v52 = vmax.f32 %v649_v46, 0.0  ;;  %v673_v53 = vmax.f32 %v657_v47, 0.0 }
 0x119   : > { %v658_v51 = vadd.f32 %v887_v49, %v1106_v35 }
 0x11a   : > { %v666_v54 = vmax.f32 %v650_v50, 0.0 }
 0x11b   : > { %v674_v55 = vmax.f32 %v658_v51, 0.0 }
 0x11c   : > { %v678_v56 = vpack.c.bf16 %v666_v54, %v665_v52 }
 0x11d   : > { %v682_v57 = vpack.c.bf16 %v674_v55, %v673_v53 }
 0x11e   : > { %686 = vst [vmem:[%s1115_s8 + $0x18] sm:$0xff] %v678_v56 }
 0x11f   : > { %690 = vst [vmem:[%s1115_s8 + $0x38] sm:$0xff] %v682_v57 }
 0x120 PF: > { %s13_s14 = sadd.s32 1, %s990_s14   ;;  %s1150_s12 = smov %s986_s13 }
 0x121   : > { %p10_p6 = scmp.ge.s32.totalorder %s13_s14, 4   ;;  %s1151_s13 = smov %s1153_s15 }
 0x123   :  { %12 = sbr.rel (!%p10_p6) target bundleno = 2 (0x2), region = 73 }

// kernel: net_attack_forward.3
= control target key start
LH: loop header
LB: loop body
LE: loop exit
PB: predicated region body
PF: predicated region fallthrough
CT: control target
= control target key end

     0   :  { %s996_s12 = smov 0   ;;  %s998_s13 = smov 0   ;;  %s1141_s0 = inlined_call_operand.vmem [shape: bf16[256,256], index: 0, kind: input, shape index: {}]   ;;  %s1142_s1 = inlined_call_operand.vmem [shape: bf16[256,128], index: 1, kind: input, shape index: {}]   ;;  %s1143_s2 = inlined_call_operand.vmem [shape: f32[1,128], index: 2, kind: input, shape index: {}]   ;;  %s1144_s3 = inlined_call_operand.vmem [shape: f32[256,128], index: 3, kind: output, shape index: {}]  }
   0x1   :  { %s1000_s14 = smov 0  }
   0x2 LB: > { %s25_s15 = sadd.s32 1, %s970_s13  ;;  %p766_p0 = scmp.ge.s32.totalorder %s974_s14, 1  ;;  %s974_s14 = sphi %s1000_s14, %s13_s14   ;;  %s970_s13 = sphi %s998_s13, %s1146_s13   ;;  %s966_s12 = sphi %s996_s12, %s1145_s12  }
   0x3   : > { %p27_p1 = scmp.ge.s32.totalorder %s25_s15, 2  ;;  %p169_p2 = scmp.lt.s32.totalorder %s974_s14, 3 }
   0x5   : > { %s1148_s15 = smov (%p27_p1, %s25_s15), 0  ;;  %p170_p3 = pnand %p766_p0, %p169_p2 }
   0x6   : > { %v912_v0 = vld [vmem:[%s1142_s1 + $0x40] sm:$0xff] (!%p170_p3)   ;;  %s767_s18 = sshll.u32 (!%p170_p3), %s966_s12, 4  ;;  %v914_v2 = vld [vmem:[%s1142_s1 + $0x48] sm:$0xff] (!%p170_p3)   ;;  %v916_v4 = vld [vmem:[%s1142_s1 + $0x50] sm:$0xff] (!%p170_p3)  }
   0x7   : > { %173 = sbr.rel (%p170_p3) target bundleno = 283 (0x11b), region = 32  ;;  %v913_v1 = vld [vmem:[%s1142_s1] sm:$0xff] (!%p170_p3)   ;;  %808 = vmatprep.subr.bf16.mxu0 (!%p170_p3), %v912_v0  ;;  %872 = vmatprep.subr.bf16.mxu1 (!%p170_p3), %v912_v0  ;;  %v915_v3 = vld [vmem:[%s1142_s1 + $0x8] sm:$0xff] (!%p170_p3)   ;;  %p205_p4 = scmp.lt.s32.totalorder (!%p170_p3), %s767_s18, 31  ;;  %v917_v5 = vld [vmem:[%s1142_s1 + $0x10] sm:$0xff] (!%p170_p3)  }
   0x8   : > { %809 = vmatpush3.bf16.msra.mxu0 (!%p170_p3), %v913_v1  ;;  %880 = vmatpush3.bf16.msra.mxu1 (!%p170_p3), %v913_v1  ;;  %v918_v6 = vld [vmem:[%s1142_s1 + $0x58] sm:$0xff] (!%p170_p3)   ;;  %v920_v8 = vld [vmem:[%s1142_s1 + $0x60] sm:$0xff] (!%p170_p3)   ;;  %v922_v10 = vld [vmem:[%s1142_s1 + $0x68] sm:$0xff] (!%p170_p3)  }
   0x9   : > { %810 = vmatprep.subr.bf16.mxu0 (!%p170_p3), %v914_v2  ;;  %873 = vmatprep.subr.bf16.mxu1 (!%p170_p3), %v914_v2  ;;  %v919_v7 = vld [vmem:[%s1142_s1 + $0x18] sm:$0xff] (!%p170_p3)   ;;  %v921_v9 = vld [vmem:[%s1142_s1 + $0x20] sm:$0xff] (!%p170_p3)   ;;  %v923_v13 = vld [vmem:[%s1142_s1 + $0x28] sm:$0xff] (!%p170_p3)  }
   0xa   : > { %v924_v14 = vld [vmem:[%s1142_s1 + $0x70] sm:$0xff] (!%p170_p3)   ;;  %v926_v16 = vld [vmem:[%s1142_s1 + $0x78] sm:$0xff] (!%p170_p3)   ;;  %v1091_v35 = vld [vmem:[%s1143_s2] ss:$0 sm:$0xff] (!%p170_p3) }
   0xb   : > { %v925_v15 = vld [vmem:[%s1142_s1 + $0x30] sm:$0xff] (!%p170_p3)   ;;  %v927_v17 = vld [vmem:[%s1142_s1 + $0x38] sm:$0xff] (!%p170_p3)  }
   0xc   : > { %811 = vmatpush3.bf16.msra.mxu0 (!%p170_p3), %v915_v3  ;;  %881 = vmatpush3.bf16.msra.mxu1 (!%p170_p3), %v915_v3 }
   0xd   : > { %812 = vmatprep.subr.bf16.mxu0 (!%p170_p3), %v916_v4  ;;  %874 = vmatprep.subr.bf16.mxu1 (!%p170_p3), %v916_v4 }
   0xe   : > { %s1150_s18 = smov (!%p205_p4, %s767_s18), 31 }
   0xf   : > { %s807_s6 = sshll.u32 %s1150_s18, 3 }
  0x10   : > { %813 = vmatpush3.bf16.msra.mxu0 %v917_v5  ;;  %882 = vmatpush3.bf16.msra.mxu1 %v917_v5  ;;  %s1049_s11 = scalar_lea.vmem %s1141_s0, %s807_s6  ;;  %s1098_s8 = scalar_lea.vmem %s1144_s3, %s807_s6 }
  0x11   : > { %814 = vmatprep.subr.bf16.mxu0 %v918_v6  ;;  %875 = vmatprep.subr.bf16.mxu1 %v918_v6  ;;  %v930_v11 = vld [vmem:[%s1049_s11 + $0x4] ss:$8 sps:$4 sm:$0xff]   ;;  %v928_v18 = vld [vmem:[%s1049_s11] ss:$8 sps:$4 sm:$0xff]   ;;  %v934_v20 = vld [vmem:[%s1049_s11 + $0x14] ss:$8 sps:$4 sm:$0xff]  }
  0x12   : > { %v933_v12 = vld [vmem:[%s1049_s11 + $0x44] ss:$8 sps:$4 sm:$0xff]   ;;  %520 = vmatprep.mubr.bf16.mxu0 %v930_v11  ;;  %v931_v19 = vld [vmem:[%s1049_s11 + $0x40] ss:$8 sps:$4 sm:$0xff]   ;;  %v936_v21 = vld [vmem:[%s1049_s11 + $0x54] ss:$8 sps:$4 sm:$0xff]  }
  0x13   : > { %552 = vmatprep.mubr.bf16.mxu1 %v933_v12  ;;  %v938_v22 = vld [vmem:[%s1049_s11 + $0x10] ss:$8 sps:$4 sm:$0xff]   ;;  %v940_v24 = vld [vmem:[%s1049_s11 + $0x24] ss:$8 sps:$4 sm:$0xff]   ;;  %v944_v26 = vld [vmem:[%s1049_s11 + $0x20] ss:$8 sps:$4 sm:$0xff]  }
  0x14   : > { %815 = vmatpush3.bf16.msra.mxu0 %v919_v7  ;;  %883 = vmatpush3.bf16.msra.mxu1 %v919_v7  ;;  %v939_v23 = vld [vmem:[%s1049_s11 + $0x50] ss:$8 sps:$4 sm:$0xff]   ;;  %v942_v25 = vld [vmem:[%s1049_s11 + $0x64] ss:$8 sps:$4 sm:$0xff]   ;;  %v945_v27 = vld [vmem:[%s1049_s11 + $0x60] ss:$8 sps:$4 sm:$0xff]  }
  0x15   : > { %816 = vmatprep.subr.bf16.mxu0 %v920_v8  ;;  %876 = vmatprep.subr.bf16.mxu1 %v920_v8  ;;  %v946_v28 = vld [vmem:[%s1049_s11 + $0x34] ss:$8 sps:$4 sm:$0xff]   ;;  %v950_v30 = vld [vmem:[%s1049_s11 + $0x30] ss:$8 sps:$4 sm:$0xff]  }
  0x16   : > { %v948_v29 = vld [vmem:[%s1049_s11 + $0x74] ss:$8 sps:$4 sm:$0xff]   ;;  %v951_v31 = vld [vmem:[%s1049_s11 + $0x70] ss:$8 sps:$4 sm:$0xff]  }
  0x18   : > { %817 = vmatpush3.bf16.msra.mxu0 %v921_v9  ;;  %884 = vmatpush3.bf16.msra.mxu1 %v921_v9 }
  0x19   : > { %818 = vmatprep.subr.bf16.mxu0 %v922_v10  ;;  %877 = vmatprep.subr.bf16.mxu1 %v922_v10 }
  0x1c   : > { %819 = vmatpush3.bf16.msra.mxu0 %v923_v13  ;;  %885 = vmatpush3.bf16.msra.mxu1 %v923_v13 }
  0x1d   : > { %820 = vmatprep.subr.bf16.mxu0 %v924_v14  ;;  %878 = vmatprep.subr.bf16.mxu1 %v924_v14 }
  0x20   : > { %821 = vmatpush3.bf16.msra.mxu0 %v925_v15  ;;  %886 = vmatpush3.bf16.msra.mxu1 %v925_v15 }
  0x21   : > { %822 = vmatprep.subr.bf16.mxu0 %v926_v16  ;;  %879 = vmatprep.subr.bf16.mxu1 %v926_v16 }
  0x24   : > { %823 = vmatpush3.bf16.msra.mxu0 %v927_v17  ;;  %887 = vmatpush3.bf16.msra.mxu1 %v927_v17 }
  0x27   : > { %521 = vmatmul.mubr.bf16.vlgmr.msra.gmra.mrb[0].mxu0 %v928_v18  ;;  %553 = vmatmul.mubr.bf16.vlgmr.msra.gmra.mrb[0].mxu1 %v931_v19 }
  0x28   : > { %528 = vmatprep.mubr.bf16.mxu0 %v934_v20  ;;  %560 = vmatprep.mubr.bf16.mxu1 %v936_v21 }
  0x2f   : > { %529 = vmatmul.mubr.bf16.gmra.mrb[4].mxu0 %v938_v22  ;;  %561 = vmatmul.mubr.bf16.gmra.mrb[4].mxu1 %v939_v23 }
  0x30   : > { %536 = vmatprep.mubr.bf16.mxu0 %v940_v24  ;;  %568 = vmatprep.mubr.bf16.mxu1 %v942_v25 }
  0x37   : > { %537 = vmatmul.mubr.bf16.gmra.mrb[8].mxu0 %v944_v26  ;;  %569 = vmatmul.mubr.bf16.gmra.mrb[8].mxu1 %v945_v27 }
  0x38   : > { %544 = vmatprep.mubr.bf16.mxu0 %v946_v28  ;;  %576 = vmatprep.mubr.bf16.mxu1 %v948_v29 }
  0x3f   : > { %545 = vmatmul.mubr.bf16.gmra.mrb[12].mxu0 %v950_v30  ;;  %577 = vmatmul.mubr.bf16.gmra.mrb[12].mxu1 %v951_v31 }
  0xfa   : > { %v824_v32 = vpop.f32.mrb[0].mxu0  ;;  %v848_v33 = vpop.f32.mrb[0].mxu1 }
  0xfb   : > { %v825_v34 = vpop.f32.mrb[1].mxu0  ;;  %v849_v36 = vpop.f32.mrb[1].mxu1 }
  0xfc   : > { %v826_v37 = vadd.f32 %v825_v34, %v824_v32  ;;  %v850_v38 = vadd.f32 %v849_v36, %v848_v33  ;;  %v827_v39 = vpop.f32.mrb[2].mxu0  ;;  %v851_v40 = vpop.f32.mrb[2].mxu1 }
  0xfd   : > { %v828_v41 = vpop.f32.mrb[3].mxu0  ;;  %v852_v42 = vpop.f32.mrb[3].mxu1 }
  0xfe   : > { %v643_v43 = vadd.f32 %v826_v37, %v1091_v35  ;;  %v651_v44 = vadd.f32 %v850_v38, %v1091_v35  ;;  %v829_v45 = vadd.f32 %v828_v41, %v827_v39  ;;  %v853_v46 = vadd.f32 %v852_v42, %v851_v40 }
 0x100   : > { %659 = vst [vmem:[%s1098_s8] sm:$0xff] %v643_v43  ;;  %667 = vst [vmem:[%s1098_s8 + $0x40] sm:$0xff] %v651_v44  ;;  %v644_v47 = vadd.f32 %v829_v45, %v1091_v35  ;;  %v652_v48 = vadd.f32 %v853_v46, %v1091_v35 }
 0x102   : > { %660 = vst [vmem:[%s1098_s8 + $0x8] sm:$0xff] %v644_v47  ;;  %668 = vst [vmem:[%s1098_s8 + $0x48] sm:$0xff] %v652_v48  ;;  %v830_v49 = vpop.f32.mrb[4].mxu0  ;;  %v854_v50 = vpop.f32.mrb[4].mxu1 }
 0x103   : > { %v831_v51 = vpop.f32.mrb[5].mxu0  ;;  %v855_v52 = vpop.f32.mrb[5].mxu1 }
 0x104   : > { %v832_v53 = vadd.f32 %v831_v51, %v830_v49  ;;  %v856_v54 = vadd.f32 %v855_v52, %v854_v50  ;;  %v833_v55 = vpop.f32.mrb[6].mxu0  ;;  %v857_v56 = vpop.f32.mrb[6].mxu1 }
 0x105   : > { %v834_v57 = vpop.f32.mrb[7].mxu0  ;;  %v858_v58 = vpop.f32.mrb[7].mxu1 }
 0x106   : > { %v645_v59 = vadd.f32 %v832_v53, %v1091_v35  ;;  %v653_v60 = vadd.f32 %v856_v54, %v1091_v35  ;;  %v835_v61 = vadd.f32 %v834_v57, %v833_v55  ;;  %v859_v62 = vadd.f32 %v858_v58, %v857_v56 }
 0x108   : > { %661 = vst [vmem:[%s1098_s8 + $0x10] sm:$0xff] %v645_v59  ;;  %669 = vst [vmem:[%s1098_s8 + $0x50] sm:$0xff] %v653_v60  ;;  %v646_v63 = vadd.f32 %v835_v61, %v1091_v35  ;;  %v654_v0 = vadd.f32 %v859_v62, %v1091_v35 }
 0x10a   : > { %662 = vst [vmem:[%s1098_s8 + $0x18] sm:$0xff] %v646_v63  ;;  %670 = vst [vmem:[%s1098_s8 + $0x58] sm:$0xff] %v654_v0  ;;  %v836_v1 = vpop.f32.mrb[8].mxu0  ;;  %v860_v2 = vpop.f32.mrb[8].mxu1 }
 0x10b   : > { %v837_v3 = vpop.f32.mrb[9].mxu0  ;;  %v861_v4 = vpop.f32.mrb[9].mxu1 }
 0x10c   : > { %v838_v5 = vadd.f32 %v837_v3, %v836_v1  ;;  %v862_v6 = vadd.f32 %v861_v4, %v860_v2  ;;  %v839_v7 = vpop.f32.mrb[10].mxu0  ;;  %v863_v8 = vpop.f32.mrb[10].mxu1 }
 0x10d   : > { %v840_v9 = vpop.f32.mrb[11].mxu0  ;;  %v864_v10 = vpop.f32.mrb[11].mxu1 }
 0x10e   : > { %v647_v11 = vadd.f32 %v838_v5, %v1091_v35  ;;  %v655_v12 = vadd.f32 %v862_v6, %v1091_v35  ;;  %v841_v13 = vadd.f32 %v840_v9, %v839_v7  ;;  %v865_v14 = vadd.f32 %v864_v10, %v863_v8 }
 0x110   : > { %663 = vst [vmem:[%s1098_s8 + $0x20] sm:$0xff] %v647_v11  ;;  %671 = vst [vmem:[%s1098_s8 + $0x60] sm:$0xff] %v655_v12  ;;  %v648_v15 = vadd.f32 %v841_v13, %v1091_v35  ;;  %v656_v16 = vadd.f32 %v865_v14, %v1091_v35 }
 0x112   : > { %664 = vst [vmem:[%s1098_s8 + $0x28] sm:$0xff] %v648_v15  ;;  %672 = vst [vmem:[%s1098_s8 + $0x68] sm:$0xff] %v656_v16  ;;  %v842_v17 = vpop.f32.mrb[12].mxu0  ;;  %v866_v18 = vpop.f32.mrb[12].mxu1 }
 0x113   : > { %v843_v19 = vpop.f32.mrb[13].mxu0  ;;  %v867_v20 = vpop.f32.mrb[13].mxu1 }
 0x114   : > { %v844_v21 = vadd.f32 %v843_v19, %v842_v17  ;;  %v868_v22 = vadd.f32 %v867_v20, %v866_v18  ;;  %v845_v23 = vpop.f32.mrb[14].mxu0  ;;  %v869_v24 = vpop.f32.mrb[14].mxu1 }
 0x115   : > { %v846_v25 = vpop.f32.mrb[15].mxu0  ;;  %v870_v26 = vpop.f32.mrb[15].mxu1 }
 0x116   : > { %v649_v27 = vadd.f32 %v844_v21, %v1091_v35  ;;  %v657_v28 = vadd.f32 %v868_v22, %v1091_v35  ;;  %v847_v29 = vadd.f32 %v846_v25, %v845_v23  ;;  %v871_v30 = vadd.f32 %v870_v26, %v869_v24 }
 0x118   : > { %665 = vst [vmem:[%s1098_s8 + $0x30] sm:$0xff] %v649_v27  ;;  %673 = vst [vmem:[%s1098_s8 + $0x70] sm:$0xff] %v657_v28  ;;  %v650_v31 = vadd.f32 %v847_v29, %v1091_v35  ;;  %v658_v32 = vadd.f32 %v871_v30, %v1091_v35 }
 0x11a   : > { %666 = vst [vmem:[%s1098_s8 + $0x38] sm:$0xff] %v650_v31  ;;  %674 = vst [vmem:[%s1098_s8 + $0x78] sm:$0xff] %v658_v32 }
 0x11b PF: > { %s13_s14 = sadd.s32 1, %s974_s14   ;;  %s1145_s12 = smov %s970_s13 }
 0x11c   : > { %p10_p5 = scmp.ge.s32.totalorder %s13_s14, 4   ;;  %s1146_s13 = smov %s1148_s15 }
 0x11e   :  { %12 = sbr.rel (!%p10_p5) target bundleno = 2 (0x2), region = 73 }

</bundles_post_ra>
